<compile_context>
chip_gen: v6e
topology: v6e:2x2x1
jax: 0.10.0
libtpu: 0.0.40
codegen_flags: <defaults>
</compile_context>

<pallas_src>
import jax
import jax.numpy as jnp
from jax import lax
from jax.experimental import pallas as pl
from jax.experimental.pallas import tpu as pltpu


def _round_up(x, m):
    return -(-x // m) * m


def fused_mlp_kernel(x1_ref, x2_ref, w12_ref, nw2_ref, b_ref, o_ref):
    """One batch tile: o = x1 @ (w1@w2) + x2 @ (-w2) + (b1@w2 + b2)."""
    # Mosaic's f32 MXU path was verified within 1e-4 of the HIGHEST-precision
    # reference for these shapes; keep preferred_element_type=f32.
    acc = jnp.dot(x1_ref[...], w12_ref[...], preferred_element_type=jnp.float32)
    acc = acc + jnp.dot(x2_ref[...], nw2_ref[...],
                        preferred_element_type=jnp.float32)
    o_ref[...] = (acc + b_ref[...]).astype(o_ref.dtype)


def model_forward(x1, x2, w1, b1, w2, b2):
    B = x1.shape[0]
    in_f = w1.shape[0]          # 8
    out_f = w2.shape[1]         # 6

    # ---- algebraic fusion (tiny, host/XLA side, full f32 precision) --------
    W12 = jnp.dot(w1, w2, precision=lax.Precision.HIGHEST)            # (8, 6)
    nW2 = -w2                                                         # (8, 6)
    b_fused = jnp.dot(b1, w2, precision=lax.Precision.HIGHEST) + b2   # (1, 6)

    # Narrow output: pad 6 -> 8 lanes only (masked vst, ~16x less writeback
    # than a 128-lane pad, near-free post-slice).
    N_pad = _round_up(out_f, 8)                                       # 8

    # Batch tile: large to amortize ~0.35us/step grid overhead, but split into
    # >=2 tiles when the batch allows so both v7x TensorCores get work via the
    # "parallel" axis.  Tiny batches fall back to the minimum 8-row tile.
    TB_MAX = 512
    if B <= 8:
        TB = 8
    elif B <= 2 * TB_MAX:
        TB = max(8, _round_up(_round_up(B, 8) // 2, 8))
    else:
        TB = TB_MAX
    B_pad = _round_up(B, TB)

    def pad_rows(a):
        return a if B_pad == B else jnp.pad(a, ((0, B_pad - B), (0, 0)))

    x1p = pad_rows(x1)
    x2p = pad_rows(x2)
    w12p = jnp.pad(W12, ((0, 0), (0, N_pad - out_f))).astype(x1.dtype)
    nw2p = jnp.pad(nW2, ((0, 0), (0, N_pad - out_f))).astype(x1.dtype)
    bp = jnp.pad(b_fused, ((0, 0), (0, N_pad - out_f))).astype(x1.dtype)

    grid = (B_pad // TB,)
    out_pad = pl.pallas_call(
        fused_mlp_kernel,
        out_shape=jax.ShapeDtypeStruct((B_pad, N_pad), x1.dtype),
        grid=grid,
        in_specs=[
            pl.BlockSpec((TB, in_f), lambda i: (i, 0)),      # x1 batch tile
            pl.BlockSpec((TB, in_f), lambda i: (i, 0)),      # x2 batch tile
            # Grid-invariant weight / bias tiles (constant index_map):
            pl.BlockSpec((in_f, N_pad), lambda i: (0, 0)),   # w1@w2 (padded)
            pl.BlockSpec((in_f, N_pad), lambda i: (0, 0)),   # -w2    (padded)
            pl.BlockSpec((1, N_pad), lambda i: (0, 0)),      # fused bias
        ],
        out_specs=pl.BlockSpec((TB, N_pad), lambda i: (i, 0)),
        compiler_params=pltpu.CompilerParams(
            dimension_semantics=("parallel",)),
    )(x1p, x2p, w12p, nw2p, bp)

    return out_pad[:B, :out_f]


def init_linear(key, in_features, out_features):
    """Deterministic nn.Linear-style init: U(-1/sqrt(in), 1/sqrt(in))."""
    kw, kb = jax.random.split(key)
    bound = 1.0 / jnp.sqrt(jnp.float32(in_features))
    # Stored pre-transposed: (in_features, out_features) so y = x @ w + b.
    w = jax.random.uniform(kw, (in_features, out_features), jnp.float32,
                           minval=-bound, maxval=bound)
    b = jax.random.uniform(kb, (1, out_features), jnp.float32,
                           minval=-bound, maxval=bound)
    return w, b


def reference_forward(x1, x2, w1, b1, w2, b2):
    v1 = jnp.dot(x1, w1, precision=lax.Precision.HIGHEST) + b1
    v2 = v1 - x2
    return jnp.dot(v2, w2, precision=lax.Precision.HIGHEST) + b2


if __name__ == "__main__":
    key = jax.random.PRNGKey(0)
    k_x1, k_x2, k_l1, k_l2, k_big1, k_big2 = jax.random.split(key, 6)

    w1, b1 = init_linear(k_l1, 8, 8)   # Linear(8, 8)
    w2, b2 = init_linear(k_l2, 8, 6)   # Linear(8, 6)

    # Spec-sized case: batch = 1 (as in the original script).
    B = 1
    x1 = jax.random.normal(k_x1, (B, 8), jnp.float32)
    x2 = jax.random.normal(k_x2, (B, 8), jnp.float32)
    out = jax.block_until_ready(model_forward(x1, x2, w1, b1, w2, b2))
    ref = reference_forward(x1, x2, w1, b1, w2, b2)
    assert out.shape == (B, 6), out.shape
    assert jnp.allclose(out, ref, atol=1e-4, rtol=1e-4), (out, ref)

    # Multi-tile case: exercises the batch grid (2 "parallel" steps) and the
    # row-padding path.
    B2 = 24
    x1b = jax.random.normal(k_big1, (B2, 8), jnp.float32)
    x2b = jax.random.normal(k_big2, (B2, 8), jnp.float32)
    outb = jax.block_until_ready(model_forward(x1b, x2b, w1, b1, w2, b2))
    refb = reference_forward(x1b, x2b, w1, b1, w2, b2)
    assert outb.shape == (B2, 6), outb.shape
    assert jnp.allclose(outb, refb, atol=1e-4, rtol=1e-4)

    print("KERNEL_OK")
</pallas_src>

<mosaic_0001>
module attributes {stable_mosaic.version = 11 : i64} {
  func.func @fused_mlp_kernel(%arg0: i32, %arg1: memref<8x8xf32, #tpu.memory_space<vmem>>, %arg2: memref<8x8xf32, #tpu.memory_space<vmem>>, %arg3: memref<8x8xf32, #tpu.memory_space<vmem>>, %arg4: memref<8x8xf32, #tpu.memory_space<vmem>>, %arg5: memref<1x8xf32, #tpu.memory_space<vmem>>, %arg6: memref<8x8xf32, #tpu.memory_space<vmem>>) attributes {dimension_semantics = [#tpu.dimension_semantics<parallel>], iteration_bounds = array<i64: 1>, scalar_prefetch = 0 : i64, scratch_operands = 0 : i64, tpu.core_type = #tpu.core_type<tc>, window_params = [{transform_indices = @transform_0, window_bounds = array<i64: 8, 8>}, {transform_indices = @transform_1, window_bounds = array<i64: 8, 8>}, {pipeline_mode = #tpu.pipeline_mode<synchronous>, transform_indices = @transform_2, window_bounds = array<i64: 8, 8>}, {pipeline_mode = #tpu.pipeline_mode<synchronous>, transform_indices = @transform_3, window_bounds = array<i64: 8, 8>}, {pipeline_mode = #tpu.pipeline_mode<synchronous>, transform_indices = @transform_4, window_bounds = array<i64: 1, 8>}, {transform_indices = @transform_5, window_bounds = array<i64: 8, 8>}]} {
    %c0 = arith.constant 0 : index
    %c0_0 = arith.constant 0 : index
    %0 = vector.load %arg1[%c0, %c0_0] : memref<8x8xf32, #tpu.memory_space<vmem>>, vector<8x8xf32>
    %c0_1 = arith.constant 0 : index
    %c0_2 = arith.constant 0 : index
    %1 = vector.load %arg3[%c0_1, %c0_2] : memref<8x8xf32, #tpu.memory_space<vmem>>, vector<8x8xf32>
    %cst = arith.constant dense<0.000000e+00> : vector<8x8xf32>
    %2 = tpu.matmul %0, %1, %cst {dimension_numbers = #tpu.dot_dimension_numbers<[1], [0], [0], [1], [0, 0, 1, 1], [], []>} : vector<8x8xf32>, vector<8x8xf32>, vector<8x8xf32> -> vector<8x8xf32>
    %c0_3 = arith.constant 0 : index
    %c0_4 = arith.constant 0 : index
    %3 = vector.load %arg2[%c0_3, %c0_4] : memref<8x8xf32, #tpu.memory_space<vmem>>, vector<8x8xf32>
    %c0_5 = arith.constant 0 : index
    %c0_6 = arith.constant 0 : index
    %4 = vector.load %arg4[%c0_5, %c0_6] : memref<8x8xf32, #tpu.memory_space<vmem>>, vector<8x8xf32>
    %cst_7 = arith.constant dense<0.000000e+00> : vector<8x8xf32>
    %5 = tpu.matmul %3, %4, %cst_7 {dimension_numbers = #tpu.dot_dimension_numbers<[1], [0], [0], [1], [0, 0, 1, 1], [], []>} : vector<8x8xf32>, vector<8x8xf32>, vector<8x8xf32> -> vector<8x8xf32>
    %6 = arith.addf %2, %5 : vector<8x8xf32>
    %c0_8 = arith.constant 0 : index
    %c0_9 = arith.constant 0 : index
    %7 = vector.load %arg5[%c0_8, %c0_9] : memref<1x8xf32, #tpu.memory_space<vmem>>, vector<1x8xf32>
    %8 = vector.broadcast %7 : vector<1x8xf32> to vector<8x8xf32>
    %9 = arith.addf %6, %8 : vector<8x8xf32>
    %c0_10 = arith.constant 0 : index
    %c0_11 = arith.constant 0 : index
    %10 = vector.load %arg6[%c0_10, %c0_11] : memref<8x8xf32, #tpu.memory_space<vmem>>, vector<8x8xf32>
    tpu.vector_store %arg6[%c0_10, %c0_11], %9 {strides = array<i32>} : memref<8x8xf32, #tpu.memory_space<vmem>>, vector<8x8xf32>,
    return
  }
  func.func @transform_0(%arg0: i32) -> (i32, i32) {
    %c0_i32 = arith.constant 0 : i32
    %c0_i32_0 = arith.constant 0 : i32
    return %arg0, %c0_i32 : i32, i32
  }
  func.func @transform_1(%arg0: i32) -> (i32, i32) {
    %c0_i32 = arith.constant 0 : i32
    %c0_i32_0 = arith.constant 0 : i32
    return %arg0, %c0_i32 : i32, i32
  }
  func.func @transform_2(%arg0: i32) -> (i32, i32) {
    %c0_i32 = arith.constant 0 : i32
    %c0_i32_0 = arith.constant 0 : i32
    %c0_i32_1 = arith.constant 0 : i32
    return %c0_i32, %c0_i32_0 : i32, i32
  }
  func.func @transform_3(%arg0: i32) -> (i32, i32) {
    %c0_i32 = arith.constant 0 : i32
    %c0_i32_0 = arith.constant 0 : i32
    %c0_i32_1 = arith.constant 0 : i32
    return %c0_i32, %c0_i32_0 : i32, i32
  }
  func.func @transform_4(%arg0: i32) -> (i32, i32) {
    %c0_i32 = arith.constant 0 : i32
    %c0_i32_0 = arith.constant 0 : i32
    %c0_i32_1 = arith.constant 0 : i32
    return %c0_i32, %c0_i32_0 : i32, i32
  }
  func.func @transform_5(%arg0: i32) -> (i32, i32) {
    %c0_i32 = arith.constant 0 : i32
    %c0_i32_0 = arith.constant 0 : i32
    return %arg0, %c0_i32 : i32, i32
  }
}

</mosaic_0001>

<bundles_post_ra>
// kernel: tpu_custom_call.1
= control target key start
LH: loop header
LB: loop body
LE: loop exit
PB: predicated region body
PF: predicated region fallthrough
CT: control target
= control target key end

     0   :  { %10 = vsyncpa [#allocation3], 0  ;;  %s435_s0 = inlined_call_operand.hbm [shape: f32[8,8], index: 0, kind: input, shape index: {}]   ;;  %s436_s1 = inlined_call_operand.hbm [shape: f32[8,8], index: 1, kind: input, shape index: {}]   ;;  %s437_s2 = inlined_call_operand.hbm [shape: f32[8,8], index: 2, kind: input, shape index: {}]   ;;  %s438_s3 = inlined_call_operand.hbm [shape: f32[8,8], index: 3, kind: input, shape index: {}]   ;;  %s439_s4 = inlined_call_operand.vmem [shape: f32[1,8], index: 4, kind: input, shape index: {}]   ;;  %s440_s5 = inlined_call_operand.hbm [shape: f32[8,8], index: 5, kind: output, shape index: {}]  }
   0x1   :  { %11 = vsyncpa [#allocation6], 0 }
   0x2   :  { %12 = vsyncpa [#allocation9], 0 }
   0x3   :  { %13 = vsyncpa [#allocation4], 0  ;;  %s377_s18 = smov [#allocation5]   ;;  %s378_s20 = smov [#allocation2]  }
   0x4   :  { %s30_s19 = sshll.u32 %s377_s18, 4  ;;  %s20_s21 = sshll.u32 %s378_s20, 4  ;;  %s31_s19 = int_to_ptr.vmem [resolvable:$true] %s30_s19  ;;  %s21_s21 = int_to_ptr.vmem [resolvable:$true] %s20_s21 }
   0x5   :  { %s277_s22 = scalar_lea.vmem %s31_s19, 128  ;;  %p282_p1 = scmp.lt.s32.totalorder %s31_s19, %s31_s19 }
   0x6   :  { %p278_p0 = scmp.ne.s32.totalorder %s31_s19, %s277_s22  ;;  %p283_p2 = scmp.lt.s32.totalorder %s277_s22, %s277_s22 }
   0x8   :  { %p284_p3 = por %p283_p2, %p282_p1 }
   0xa   :  { %p285_p4 = pnand %p284_p3, %p278_p0 }
   0xc   :  { %288 = shalt.err (!%p285_p4)
}
   0xd   :  { %33 = dma.hbm_to_vmem [thread:$0]  %s436_s1, 128, %s31_s19, [#allocation6]  }
   0xe   :  { %s297_s25 = scalar_lea.vmem %s21_s21, 128  ;;  %p302_p6 = scmp.lt.s32.totalorder %s21_s21, %s21_s21 }
   0xf   :  { %p298_p5 = scmp.ne.s32.totalorder %s21_s21, %s297_s25  ;;  %p303_p7 = scmp.lt.s32.totalorder %s297_s25, %s297_s25 }
  0x11   :  { %p304_p8 = por %p303_p7, %p302_p6 }
  0x13   :  { %p305_p9 = pnand %p304_p8, %p298_p5 }
  0x15   :  { %308 = shalt.err (!%p305_p9)
}
  0x16   :  { %23 = dma.hbm_to_vmem [thread:$0]  %s435_s0, 128, %s21_s21, [#allocation3]  }
  0x17   :  { %s379_s28 = smov [#allocation7]   ;;  %s380_s30 = smov [#allocation8]  }
  0x18   :  { %s40_s29 = sshll.u32 %s379_s28, 4  ;;  %s50_s6 = sshll.u32 %s380_s30, 4  ;;  %s41_s29 = int_to_ptr.vmem [resolvable:$true] %s40_s29  ;;  %s51_s6 = int_to_ptr.vmem [resolvable:$true] %s50_s6 }
  0x19   :  { %s317_s7 = scalar_lea.vmem %s41_s29, 128  ;;  %p322_p11 = scmp.lt.s32.totalorder %s41_s29, %s41_s29 }
  0x1a   :  { %p318_p10 = scmp.ne.s32.totalorder %s41_s29, %s317_s7  ;;  %p323_p12 = scmp.lt.s32.totalorder %s317_s7, %s317_s7 }
  0x1c   :  { %p324_p13 = por %p323_p12, %p322_p11 }
  0x1e   :  { %p325_p0 = pnand %p324_p13, %p318_p10 }
  0x20   :  { %328 = shalt.err (!%p325_p0)
}
  0x21   :  { %43 = dma.hbm_to_vmem [thread:$0]  %s437_s2, 128, %s41_s29, [#allocation6]  }
  0x22   :  { %s337_s9 = scalar_lea.vmem %s51_s6, 128  ;;  %p342_p2 = scmp.lt.s32.totalorder %s51_s6, %s51_s6 }
  0x23   :  { %p338_p1 = scmp.ne.s32.totalorder %s51_s6, %s337_s9  ;;  %p343_p3 = scmp.lt.s32.totalorder %s337_s9, %s337_s9 }
  0x25   :  { %p344_p4 = por %p343_p3, %p342_p2 }
  0x27   :  { %p345_p5 = pnand %p344_p4, %p338_p1 }
  0x29   :  { %348 = shalt.err (!%p345_p5)
}
  0x2a   :  { %53 = dma.hbm_to_vmem [thread:$0]  %s438_s3, 128, %s51_s6, [#allocation9]  }
  0x2b   :  { %369 = dma.done.wait [#allocation3], 128  }
  0x2c   :  { %370 = vsyncadd [#allocation3], 4294967168 }
  0x2d   :  { %371 = dma.done.wait [#allocation6], 256  }
  0x2e   :  { %372 = vsyncadd [#allocation6], 4294967040 }
  0x2f   :  { %373 = dma.done.wait [#allocation9], 128  }
  0x30   :  { %374 = vsyncadd [#allocation9], 4294967168  ;;  %v381_v0 = vmov 0.0   ;;  %vm382_vm0 = vmmov 0   ;;  %vm72_vm1 = vcmask 64512   ;;  %v71_v1 = vld [vmem:[#allocation8] sm:$0xff] }
  0x31   :  { %252 = vmatprep.subr.mxu0 %v381_v0  ;;  %257 = vmatprep.subr.mxu1 %v381_v0  ;;  %v69_v2 = vld [vmem:[#allocation7] sm:$0xff]  ;;  %v70_v3 = vld [vmem:[#allocation5] sm:$0xff]  ;;  %v68_v4 = vld [vmem:[#allocation2] sm:$0xff]  ;;  %s383_s11 = smov [#allocation10]  }
  0x32   :  { %254 = vmatprep.mubr.msk.f32.mxu0 %vm382_vm0, %v381_v0  ;;  %259 = vmatprep.mubr.msk.f32.mxu1 %vm382_vm0, %v381_v0  ;;  %v247_v7 = vld [vmem:[%s439_s4] ss:$0 sm:$0xff]  ;;  %s234_s12 = sshll.u32 %s383_s11, 4  ;;  %s235_s12 = int_to_ptr.vmem [resolvable:$true] %s234_s12 }
  0x33   :  { %253 = vmatpush3.msra.mxu0 %v71_v1  ;;  %258 = vmatpush3.msra.mxu1 %v69_v2  ;;  %s349_s13 = scalar_lea.vmem %s235_s12, 128  ;;  %p354_p7 = scmp.lt.s32.totalorder %s235_s12, %s235_s12 }
  0x34   :  { %255 = vmatmul.mubr.msk.f32.vlgmr.msra.gmra.mxu0 %vm72_vm1, %v70_v3  ;;  %260 = vmatmul.mubr.msk.f32.vlgmr.msra.gmra.mxu1 %vm72_vm1, %v68_v4  ;;  %p350_p6 = scmp.ne.s32.totalorder %s235_s12, %s349_s13  ;;  %p355_p8 = scmp.lt.s32.totalorder %s349_s13, %s349_s13 }
  0x36   :  { %p356_p9 = por %p355_p8, %p354_p7 }
  0x38   :  { %p357_p10 = pnand %p356_p9, %p350_p6 }
  0xf4   :  { %v142_v5 = vpop.f32.mrf.mxu0  ;;  %v215_v6 = vpop.f32.mrf.mxu1 }
  0xf5   :  { %v216_v8 = vadd.f32 %v215_v6, %v142_v5 }
  0xf6   :  { %v256_v9 = vpop.f32.mrf.mxu0  ;;  %v261_v10 = vpop.f32.mrf.mxu1 }
  0xf7   :  { %v226_v11 = vadd.f32 %v247_v7, %v216_v8 }
  0xf9   :  { %227 = vst.msk [vmem:[#allocation10] sm:$0xff] %vm72_vm1, %v226_v11 }
  0xfa   :  { %360 = shalt.err (!%p357_p10)
}
  0xfb   :  { %237 = dma.vmem_to_hbm [thread:$0]  %s235_s12, 128, %s440_s5, [#allocation4]  }
  0xfc   :  { %375 = dma.done.wait [#allocation4], 128  }
  0xfd   :  { %376 = vsyncadd [#allocation4], 4294967168 }
  0xfe   :  { %241 = vsyncpa [#allocation3], 1 }
  0xff   :  { %242 = vsyncpa [#allocation6], 1 }
 0x100   :  { %243 = vsyncpa [#allocation9], 1 }
 0x101   :  { %244 = vsyncpa [#allocation4], 1 }

</bundles_post_ra>
